<compile_context>
chip_gen: v5e
topology: v5e:2x2
jax: 0.10.0
libtpu: 0.0.40
codegen_flags: <defaults>
</compile_context>

<pallas_src>
import functools

import jax
import jax.numpy as jnp
from jax import lax
from jax.experimental import pallas as pl
from jax.experimental.pallas import tpu as pltpu


def se_kernel(x_ref, w1_ref, w2_ref, o_ref, *, inv_hw):
    # x_ref block: (Bt, C, HWp); HWp is the (padded) spatial extent, pad cols are 0.
    x = x_ref[...]                                        # native dtype, no f32 copy

    # Global average pool (AdaptiveAvgPool2d(1)) with f32 accumulation.
    # Padded lanes are zero so they do not perturb the sum; divide by true H*W.
    y = jnp.sum(x, axis=-1, dtype=jnp.float32) * inv_hw   # (Bt, C) f32

    w1 = w1_ref[...].astype(jnp.float32)                  # (Cr, C)  PyTorch layout
    w2 = w2_ref[...].astype(jnp.float32)                  # (C, Cr)

    # fc1: y @ w1.T -> (Bt, Cr), ReLU
    h = lax.dot_general(y, w1, (((1,), (1,)), ((), ())),
                        preferred_element_type=jnp.float32)
    h = jnp.maximum(h, 0.0)
    # fc2: h @ w2.T -> (Bt, C), Sigmoid (EUP)
    s = lax.dot_general(h, w2, (((1,), (1,)), ((), ())),
                        preferred_element_type=jnp.float32)
    s = jax.nn.sigmoid(s).astype(x.dtype)                 # cast gate once

    # Channel-wise rescale, broadcast over the (lane-dense) spatial axis.
    o_ref[...] = x * s[:, :, None]


def _vmem_capacity_bytes():
    """Physical VMEM per TensorCore for the current generation (with fallback)."""
    try:
        return int(pltpu.get_tpu_info().vmem_capacity_bytes)
    except Exception:
        return 64 << 20   # conservative: v7x per-TC VMEM; v5e/v6e have 128 MiB


def _pick_batch_tile(B, per_image_bytes, *, target_block_bytes, block_budget_bytes,
                     min_steps):
    """Largest divisor of B such that (a) the block stays under the byte target,
    (b) the double-buffered in+out footprint (4*bt*per_image) fits the VMEM
    budget, and (c) the grid keeps at least min(B, min_steps) steps so the
    pipeline overlaps and v7x's two TCs both get work."""
    per_image_bytes = max(per_image_bytes, 1)
    cap = min(
        max(1, target_block_bytes // per_image_bytes),
        max(1, block_budget_bytes // (4 * per_image_bytes)),
        max(1, B // max(min(B, min_steps), 1)),
        B,
    )
    bt = max(1, cap)
    while B % bt:
        bt -= 1
    return bt


def se_layer(x, fc1_w, fc2_w, *, target_block_bytes=4 << 20, donate_input=False):
    """x: (B, C, H, W); fc1_w: (C//r, C); fc2_w: (C, C//r). Returns (B, C, H, W)."""
    B, C, H, W = x.shape
    HW = H * W
    Cr = fc1_w.shape[0]

    # Lane-dense spatial axis: pad H*W up to a multiple of 128 so output stores
    # are unmasked vst (the biggest measured lever for real SE shapes where
    # H*W = 49 / 196 / 784 / ...).  Mean uses the true H*W below.
    # TODO(synk): a channels-last (B, H*W, C) layout would avoid the pad/slice
    # passes entirely when the surrounding model can supply it.
    HWp = ((HW + 127) // 128) * 128
    xf = x.reshape(B, C, HW)
    if HWp != HW:
        xf = jnp.pad(xf, ((0, 0), (0, 0), (0, HWp - HW)))

    per_image = C * HWp * x.dtype.itemsize
    w_bytes = 8 * (fc1_w.size + fc2_w.size)               # native + f32 staging, generous
    slack = 4 << 20
    phys_vmem = _vmem_capacity_bytes()
    block_budget = max((phys_vmem * 3) // 4 - w_bytes - slack, 4 * per_image)

    bt = _pick_batch_tile(
        B, per_image,
        target_block_bytes=target_block_bytes,
        block_budget_bytes=block_budget,
        min_steps=4,
    )
    # TODO(synk): when a single image (bt=1) still exceeds the VMEM budget
    # (huge C*H*W, most likely on v7x's 64 MiB), switch to an in-kernel two-pass
    # spatial pipeline (pltpu.emit_pipeline over HW chunks: accumulate the mean,
    # then re-stream and apply the gate) instead of one resident block.

    # VMEM limit = actual double-buffered footprint (in + out blocks) + weights + slack.
    vmem_limit = 4 * bt * per_image + w_bytes + slack
    vmem_limit = int(max(vmem_limit, 32 << 20))
    vmem_limit = int(min(vmem_limit, phys_vmem - (4 << 20)))

    kernel = functools.partial(se_kernel, inv_hw=1.0 / HW)

    out = pl.pallas_call(
        kernel,
        out_shape=jax.ShapeDtypeStruct((B, C, HWp), x.dtype),
        grid_spec=pltpu.PrefetchScalarGridSpec(
            num_scalar_prefetch=0,
            grid=(B // bt,),
            in_specs=[
                pl.BlockSpec((bt, C, HWp), lambda b: (b, 0, 0)),
                pl.BlockSpec((Cr, C), lambda b: (0, 0)),
                pl.BlockSpec((C, Cr), lambda b: (0, 0)),
            ],
            out_specs=pl.BlockSpec((bt, C, HWp), lambda b: (b, 0, 0)),
        ),
        compiler_params=pltpu.CompilerParams(
            dimension_semantics=("parallel",),
            vmem_limit_bytes=vmem_limit,
        ),
        input_output_aliases=({0: 0} if donate_input else {}),
    )(xf, fc1_w, fc2_w)

    if HWp != HW:
        out = out[:, :, :HW]
    return out.reshape(B, C, H, W)


def se_layer_ref(x, fc1_w, fc2_w):
    # pure-JAX reference mirroring the PyTorch forward
    y = jnp.mean(x, axis=(2, 3))                           # (B, C)
    y = jnp.maximum(y @ fc1_w.T, 0.0)                      # (B, C//r)
    y = jax.nn.sigmoid(y @ fc2_w.T)                        # (B, C)
    return x * y[:, :, None, None]


if __name__ == "__main__":
    key = jax.random.PRNGKey(0)

    def run_case(B, C, H, W, reduction, case_key):
        Cr = max(C // reduction, 1)
        kx, k1, k2 = jax.random.split(case_key, 3)
        x = jax.random.normal(kx, (B, C, H, W), dtype=jnp.float32)
        # deterministic synthetic parameters (PyTorch nn.Linear weights, bias=False)
        fc1_w = jax.random.normal(k1, (Cr, C), dtype=jnp.float32) * 0.1
        fc2_w = jax.random.normal(k2, (C, Cr), dtype=jnp.float32) * 0.1

        out = jax.block_until_ready(se_layer(x, fc1_w, fc2_w))
        ref = se_layer_ref(x, fc1_w, fc2_w)
        assert out.shape == (B, C, H, W)
        assert jnp.allclose(out, ref, atol=1e-5, rtol=1e-5), (
            f"mismatch vs reference for shape {(B, C, H, W)}")

    k0, k1 = jax.random.split(key)
    # Lane-dense case: HW = 256 (multiple of 128); bt = 2 -> grid of 4 steps.
    run_case(8, 64, 16, 16, 16, k0)
    # Ragged case: HW = 49 -> padded to 128 inside the wrapper; grid of 4 steps.
    run_case(4, 32, 7, 7, 8, k1)

    print("KERNEL_OK")
</pallas_src>

<mosaic_0001>
module attributes {stable_mosaic.version = 11 : i64} {
  func.func @se_kernel(%arg0: i32, %arg1: memref<2x64x256xf32, #tpu.memory_space<vmem>>, %arg2: memref<4x64xf32, #tpu.memory_space<vmem>>, %arg3: memref<64x4xf32, #tpu.memory_space<vmem>>, %arg4: memref<2x64x256xf32, #tpu.memory_space<vmem>>) attributes {dimension_semantics = [#tpu.dimension_semantics<parallel>], iteration_bounds = array<i64: 4>, scalar_prefetch = 0 : i64, scratch_operands = 0 : i64, tpu.core_type = #tpu.core_type<tc>, window_params = [{transform_indices = @transform_0, window_bounds = array<i64: 2, 64, 256>}, {pipeline_mode = #tpu.pipeline_mode<synchronous>, transform_indices = @transform_1, window_bounds = array<i64: 4, 64>}, {pipeline_mode = #tpu.pipeline_mode<synchronous>, transform_indices = @transform_2, window_bounds = array<i64: 64, 4>}, {transform_indices = @transform_3, window_bounds = array<i64: 2, 64, 256>}]} {
    %c0 = arith.constant 0 : index
    %c0_0 = arith.constant 0 : index
    %c0_1 = arith.constant 0 : index
    %0 = vector.load %arg1[%c0, %c0_0, %c0_1] : memref<2x64x256xf32, #tpu.memory_space<vmem>>, vector<2x64x256xf32>
    %cst = arith.constant dense<0.000000e+00> : vector<2x64xf32>
    %1 = vector.multi_reduction <add>, %0, %cst [2] : vector<2x64x256xf32> to vector<2x64xf32>
    %cst_2 = arith.constant 3.906250e-03 : f32
    %2 = vector.broadcast %cst_2 : f32 to vector<2x64xf32>
    %3 = arith.mulf %1, %2 : vector<2x64xf32>
    %c0_3 = arith.constant 0 : index
    %c0_4 = arith.constant 0 : index
    %4 = vector.load %arg2[%c0_3, %c0_4] : memref<4x64xf32, #tpu.memory_space<vmem>>, vector<4x64xf32>
    %c0_5 = arith.constant 0 : index
    %c0_6 = arith.constant 0 : index
    %5 = vector.load %arg3[%c0_5, %c0_6] : memref<64x4xf32, #tpu.memory_space<vmem>>, vector<64x4xf32>
    %cst_7 = arith.constant dense<0.000000e+00> : vector<2x4xf32>
    %6 = tpu.matmul %3, %4, %cst_7 {dimension_numbers = #tpu.dot_dimension_numbers<[1], [1], [0], [0], [0, 0, 1, 0], [], []>} : vector<2x64xf32>, vector<4x64xf32>, vector<2x4xf32> -> vector<2x4xf32>
    %cst_8 = arith.constant 0.000000e+00 : f32
    %7 = vector.broadcast %cst_8 : f32 to vector<2x4xf32>
    %8 = arith.maximumf %6, %7 : vector<2x4xf32>
    %cst_9 = arith.constant dense<0.000000e+00> : vector<2x64xf32>
    %9 = tpu.matmul %8, %5, %cst_9 {dimension_numbers = #tpu.dot_dimension_numbers<[1], [1], [0], [0], [0, 0, 1, 0], [], []>} : vector<2x4xf32>, vector<64x4xf32>, vector<2x64xf32> -> vector<2x64xf32>
    %10 = arith.negf %9 : vector<2x64xf32>
    %11 = math.exp %10 : vector<2x64xf32>
    %cst_10 = arith.constant 1.000000e+00 : f32
    %12 = vector.broadcast %cst_10 : f32 to vector<2x64xf32>
    %13 = arith.addf %12, %11 : vector<2x64xf32>
    %14 = arith.divf %12, %13 : vector<2x64xf32>
    %15 = vector.shape_cast %14 : vector<2x64xf32> to vector<2x64x1xf32>
    %16 = vector.broadcast %15 : vector<2x64x1xf32> to vector<2x64x256xf32>
    %17 = arith.mulf %0, %16 : vector<2x64x256xf32>
    %c0_11 = arith.constant 0 : index
    %c0_12 = arith.constant 0 : index
    %c0_13 = arith.constant 0 : index
    %18 = vector.load %arg4[%c0_11, %c0_12, %c0_13] : memref<2x64x256xf32, #tpu.memory_space<vmem>>, vector<2x64x256xf32>
    tpu.vector_store %arg4[%c0_11, %c0_12, %c0_13], %17 {strides = array<i32>} : memref<2x64x256xf32, #tpu.memory_space<vmem>>, vector<2x64x256xf32>,
    return
  }
  func.func @transform_0(%arg0: i32) -> (i32, i32, i32) {
    %c0_i32 = arith.constant 0 : i32
    %c0_i32_0 = arith.constant 0 : i32
    %c0_i32_1 = arith.constant 0 : i32
    return %arg0, %c0_i32, %c0_i32_0 : i32, i32, i32
  }
  func.func @transform_1(%arg0: i32) -> (i32, i32) {
    %c0_i32 = arith.constant 0 : i32
    %c0_i32_0 = arith.constant 0 : i32
    %c0_i32_1 = arith.constant 0 : i32
    return %c0_i32, %c0_i32_0 : i32, i32
  }
  func.func @transform_2(%arg0: i32) -> (i32, i32) {
    %c0_i32 = arith.constant 0 : i32
    %c0_i32_0 = arith.constant 0 : i32
    %c0_i32_1 = arith.constant 0 : i32
    return %c0_i32, %c0_i32_0 : i32, i32
  }
  func.func @transform_3(%arg0: i32) -> (i32, i32, i32) {
    %c0_i32 = arith.constant 0 : i32
    %c0_i32_0 = arith.constant 0 : i32
    %c0_i32_1 = arith.constant 0 : i32
    return %arg0, %c0_i32, %c0_i32_0 : i32, i32, i32
  }
}

</mosaic_0001>

<bundles_post_ra>
// kernel: tpu_custom_call.1
= control target key start
LH: loop header
LB: loop body
LE: loop exit
PB: predicated region body
PF: predicated region fallthrough
CT: control target
= control target key end

     0   :  { %8 = vsyncpa [#allocation3], 0  ;;  %s1308_s0 = inlined_call_operand.hbm [shape: f32[8,64,256], index: 0, kind: input, shape index: {}]   ;;  %s1309_s1 = inlined_call_operand.vmem [shape: f32[4,64], index: 1, kind: input, shape index: {}]   ;;  %s1310_s2 = inlined_call_operand.vmem [shape: f32[64,4], index: 2, kind: input, shape index: {}]   ;;  %s1311_s3 = inlined_call_operand.hbm [shape: f32[8,64,256], index: 3, kind: output, shape index: {}]  }
   0x1   :  { %10 = vsyncpa [#allocation3 + $0x1], 0 }
   0x2   :  { %11 = vsyncpa [#allocation4], 0 }
   0x3   :  { %13 = vsyncpa [#allocation4 + $0x1], 0  ;;  %s934_s12 = smov 0   ;;  %s936_s13 = smov 0  }
   0x4   :  { %s938_s14 = smov 0   ;;  %s940_s15 = smov 0  }
   0x5 LB: > { %s955_s16 = sadd.s32 4294967295, %s908_s15   ;;  %s709_s17 = sadd.s32 4294967294, %s908_s15   ;;  %s908_s15 = sphi %s940_s15, %s1322_s15   ;;  %s904_s14 = sphi %s938_s14, %s1321_s14   ;;  %s900_s13 = sphi %s936_s13, %s1320_s13   ;;  %s896_s12 = sphi %s934_s12, %s1319_s12  }
   0x6   : > { %s959_s18 = sadd.s32 1, %s908_s15   ;;  %s26_s19 = sadd.s32 1, %s904_s14 }
   0x7   : > { %s23_s20 = ssub.s32 %s908_s15, %s959_s18  ;;  %p33_p0 = scmp.ne.s32.totalorder %s904_s14, %s900_s13 }
   0x8   : > { %p24_p1 = scmp.eq.s32.totalorder %s23_s20, 0  ;;  %p34_p2 = scmp.eq.s32.totalorder %s908_s15, 0 }
   0x9   : > { %p39_p3 = scmp.ne.s32.totalorder %s900_s13, %s896_s12  ;;  %p40_p4 = scmp.eq.s32.totalorder %s955_s16, 0 }
   0xa   : > { %s971_s21 = scalar_select %p24_p1, %s904_s14, %s26_s19  }
   0xb   : > { %p973_p5 = por %p34_p2, %p33_p0  ;;  %p977_p6 = por %p40_p4, %p39_p3 }
   0xc   : > { %p105_p7 = scmp.eq.s32.totalorder %s955_s16, 3  ;;  %p111_p8 = scmp.eq.s32.totalorder %s709_s17, 3 }
   0xd   : > { %p753_p9 = scmp.lt.s32.totalorder %s908_s15, 4  ;;  %s137_s26 = sand.u32 1, %s904_s14  }
   0xe   : > { %p983_p10 = por %p105_p7, %p33_p0  ;;  %p987_p11 = por %p111_p8, %p39_p3 }
   0xf   : > { %s738_s27 = sshll.u32 %s908_s15, 8  ;;  %s712_s28 = sshll.u32 %s137_s26, 8 }
  0x10   : > { %s147_s4 = scalar_lea.hbm %s1308_s0, %s738_s27  ;;  %s141_s6 = scalar_lea.vmem [#allocation2], %s712_s28 }
  0x11   : > { %s148_s5 = sshll.u32 %s147_s4, 4  ;;  %s150_s7 = sshll.u32 %s141_s6, 4  ;;  %s149_s5 = int_to_ptr.hbm [resolvable:$true] %s148_s5  ;;  %s151_s7 = int_to_ptr.vmem [resolvable:$true] %s150_s7 }
  0x12   : > { %p998_p12 = pnand %p753_p9, %p973_p5  ;;  %p716_p13 = scmp.ge.s32.totalorder %s908_s15, 1 }
  0x13   : > { %p158_p0 = scmp.lt.s32.totalorder %s908_s15, 5  ;;  %s138_s9 = scalar_lea.sflag [#allocation3], %s137_s26 }
  0x14   : > { %s812_s10 = sshra.s32 %s149_s5, 4  ;;  %p816_p2 = pneg %p998_p12  ;;  %s813_s10 = int_to_ptr.hbm [resolvable:$true] %s812_s10 }
  0x15   : > { %s814_s11 = scalar_lea.hbm %s813_s10, 256  ;;  %s819_s20 = scalar_lea.hbm %s1308_s0, 1024 }
  0x16   : > { %p815_p1 = scmp.ne.s32.totalorder %s813_s10, %s814_s11  ;;  %p820_p5 = scmp.lt.s32.totalorder %s813_s10, %s1308_s0 }
  0x17   : > { %p821_p7 = scmp.lt.s32.totalorder %s819_s20, %s814_s11 }
  0x18   : > { %p817_p3 = pnand %p816_p2, %p815_p1 }
  0x19   : > { %p822_p8 = por %p821_p7, %p820_p5 }
  0x1a   : > { %p818_p4 = pneg %p817_p3 }
  0x1c   : > { %p823_p9 = pnand %p822_p8, %p818_p4 }
  0x1e   : > { %826 = shalt.err (!%p823_p9)
}
  0x1f   : > { %s910_s26 = smov 256   ;;  %s911_s28 = smov 16  }
  0x20   : > { %748 = dma.hbm_to_vmem [thread:$0]  (!%p998_p12), %s149_s5, 4096, %s151_s7, %s138_s9, %s910_s26, %s910_s26, %s911_s28  }
  0x21   : > { %p159_p1 = pnand %p716_p13, %p158_p0 }
  0x22   : > { %s1019_s29 = sand.u32 (!%p159_p1), 1, %s900_s13  }
  0x23   : > { %162 = sbr.rel (%p159_p1) target bundleno = 694 (0x2b6), region = 32  ;;  %s717_s30 = sshll.u32 (!%p159_p1), %s1019_s29, 8 }
  0x24   : > { %s165_s4 = scalar_lea.sflag (!%p159_p1), [#allocation3], %s1019_s29  ;;  %s1025_s6 = scalar_lea.vmem (!%p159_p1), [#allocation2], %s717_s30 }
  0x28   : > { %887 = dma.done.wait (%p977_p6), %s165_s4, 4096  }
  0x29   : > { %889 = vsyncadd (%p977_p6), %s165_s4, 4294963200  ;;  %v1032_v0 = vld [vmem:[%s1025_s6 + $0x80] sm:$0xff]  ;;  %v1035_v1 = vld [vmem:[%s1025_s6 + $0x88] sm:$0xff]  ;;  %vm363_vm0 = vcmask 523264   ;;  %vm390_vm1 = vcmask 31744   ;;  %v1312_v60 = vlaneseq  ;;  %vm320_vm2 = vcmask 130112  }
  0x2a   : > { %v1038_v2 = vld [vmem:[%s1025_s6] sm:$0xff]  ;;  %v250_v3 = vadd.f32 %v1035_v1, %v1032_v0  ;;  %v1043_v4 = vld [vmem:[%s1025_s6 + $0x8] sm:$0xff]  ;;  %v1056_v9 = vld [vmem:[%s1025_s6 + $0x90] sm:$0xff]  ;;  %vm324_vm3 = vcmask 195712   ;;  %vm328_vm4 = vcmask 261312   ;;  %vm332_vm5 = vcmask 326912  }
  0x2b   : > { %v1046_v5 = vld [vmem:[%s1025_s6 + $0x20] sm:$0xff]  ;;  %v1049_v6 = vld [vmem:[%s1025_s6 + $0x28] sm:$0xff]  ;;  %v226_v7 = vadd.f32 %v1043_v4, %v1038_v2  ;;  %v1059_v10 = vld [vmem:[%s1025_s6 + $0x98] sm:$0xff]  ;;  %v316_v62 = vand.u32 127, %v1312_v60  ;;  %vm336_vm6 = vcmask 392512   ;;  %vm340_vm7 = vcmask 458112  }
  0x2c   : > { %v232_v8 = vadd.f32 %v1049_v6, %v1046_v5  ;;  %251 = vadd.xlane.f32.xlu1 %v250_v3  ;;  %v1062_v11 = vld [vmem:[%s1025_s6 + $0x10] sm:$0xff]  ;;  %v1065_v12 = vld [vmem:[%s1025_s6 + $0x18] sm:$0xff]  ;;  %v1068_v13 = vld [vmem:[%s1025_s6 + $0xa0] sm:$0xff]  ;;  %v253_v15 = vadd.f32 %v1059_v10, %v1056_v9  ;;  %vm344_vm8 = vcmask 523712   ;;  %vm361_vm9 = vcmask 1041409   ;;  %s1211_s7 = scalar_lea.vmem [#allocation5], %s717_s30 }
  0x2d   : > { %227 = vadd.xlane.f32.xlu0 %v226_v7  ;;  %v1071_v14 = vld [vmem:[%s1025_s6 + $0xa8] sm:$0xff]  ;;  %v229_v16 = vadd.f32 %v1065_v12, %v1062_v11  ;;  %v1080_v18 = vld [vmem:[%s1025_s6 + $0xb0] sm:$0xff]  ;;  %v1083_v19 = vld [vmem:[%s1025_s6 + $0xb8] sm:$0xff]  ;;  %s740_s30 = sshll.u32 %s955_s16, 8  ;;  %s633_s11 = sshll.u32 %s1211_s7, 4  ;;  %s634_s11 = int_to_ptr.vmem [resolvable:$true] %s633_s11 }
  0x2e   : > { %233 = vadd.xlane.f32.xlu2 %v232_v8  ;;  %v256_v17 = vadd.f32 %v1071_v14, %v1068_v13  ;;  %v1086_v20 = vld [vmem:[%s1025_s6 + $0x30] sm:$0xff]  ;;  %v1089_v21 = vld [vmem:[%s1025_s6 + $0x38] sm:$0xff]  ;;  %v1092_v22 = vld [vmem:[%s1025_s6 + $0x40] sm:$0xff]  ;;  %v259_v24 = vadd.f32 %v1083_v19, %v1080_v18  ;;  %v318_v8 = vadd.s32 4294967288, %v316_v62  ;;  %s632_s10 = scalar_lea.hbm %s1311_s3, %s740_s30  ;;  %s620_s19 = scalar_lea.sflag [#allocation4], %s1019_s29 }
  0x2f   : > { %v1095_v23 = vld [vmem:[%s1025_s6 + $0x48] sm:$0xff]  ;;  %v235_v25 = vadd.f32 %v1089_v21, %v1086_v20  ;;  %v1104_v27 = vld [vmem:[%s1025_s6 + $0x50] sm:$0xff]  ;;  %v1107_v28 = vld [vmem:[%s1025_s6 + $0x58] sm:$0xff]  ;;  %s635_s17 = sshll.u32 %s632_s10, 4  ;;  %s862_s26 = scalar_lea.hbm %s1311_s3, 1024  ;;  %s636_s17 = int_to_ptr.hbm [resolvable:$true] %s635_s17 }
  0x30   : > { %v238_v26 = vadd.f32 %v1095_v23, %v1092_v22  ;;  %v1110_v29 = vld [vmem:[%s1025_s6 + $0xc0] sm:$0xff]  ;;  %v1113_v30 = vld [vmem:[%s1025_s6 + $0xc8] sm:$0xff]  ;;  %v1116_v31 = vld [vmem:[%s1025_s6 + $0xd0] sm:$0xff]  ;;  %v241_v33 = vadd.f32 %v1107_v28, %v1104_v27  ;;  %s856_s16 = sshra.s32 %s636_s17, 4  ;;  %s857_s16 = int_to_ptr.hbm [resolvable:$true] %s856_s16 }
  0x31   : > { %v1119_v32 = vld [vmem:[%s1025_s6 + $0xd8] sm:$0xff]  ;;  %v262_v34 = vadd.f32 %v1113_v30, %v1110_v29  ;;  %v1128_v36 = vld [vmem:[%s1025_s6 + $0xe0] sm:$0xff]  ;;  %v1131_v37 = vld [vmem:[%s1025_s6 + $0xe8] sm:$0xff]  ;;  %s858_s20 = scalar_lea.hbm %s857_s16, 256  ;;  %p863_p0 = scmp.lt.s32.totalorder %s857_s16, %s1311_s3 }
  0x32   : > { %v265_v35 = vadd.f32 %v1119_v32, %v1116_v31  ;;  %v1134_v38 = vld [vmem:[%s1025_s6 + $0x60] sm:$0xff]  ;;  %v1137_v39 = vld [vmem:[%s1025_s6 + $0x68] sm:$0xff]  ;;  %v1140_v40 = vld [vmem:[%s1025_s6 + $0x70] sm:$0xff]  ;;  %v268_v42 = vadd.f32 %v1131_v37, %v1128_v36  ;;  %p859_p6 = scmp.ne.s32.totalorder %s857_s16, %s858_s20  ;;  %p864_p2 = scmp.lt.s32.totalorder %s862_s26, %s858_s20 }
  0x33   : > { %v1143_v41 = vld [vmem:[%s1025_s6 + $0x78] sm:$0xff]  ;;  %v244_v43 = vadd.f32 %v1137_v39, %v1134_v38  ;;  %v1152_v45 = vld [vmem:[%s1025_s6 + $0xf0] sm:$0xff]  ;;  %v290_v54 = vld [vmem:[%s1309_s1] sm:$0xf] }
  0x34   : > { %254 = vadd.xlane.f32.xlu1 %v253_v15  ;;  %v247_v44 = vadd.f32 %v1143_v41, %v1140_v40  ;;  %v1155_v46 = vld [vmem:[%s1025_s6 + $0xf8] sm:$0xff]  ;;  %719 = vmatpush.xpose.msk.msra.mxu0 %vm363_vm0, %v290_v54  ;;  %v297_v59 = vld [vmem:[%s1310_s2 + $0x30] sm:$0xff]  ;;  %v296_v61 = vld [vmem:[%s1310_s2 + $0x28] sm:$0xff]  ;;  %p860_p12 = pnand %p859_p6, %p983_p10  ;;  %p865_p3 = por %p864_p2, %p863_p0 }
  0x35   : > { %230 = vadd.xlane.f32.xlu0 %v229_v16  ;;  %v271_v47 = vadd.f32 %v1155_v46, %v1152_v45  ;;  %v298_v56 = vld [vmem:[%s1310_s2 + $0x38] sm:$0xff]  ;;  %v295_v16 = vld [vmem:[%s1310_s2 + $0x20] sm:$0xff] }
  0x36   : > { %257 = vadd.xlane.f32.xlu2 %v256_v17  ;;  %721 = vmatpush.xpose.msk.msra.mxu1 %vm390_vm1, %v298_v56  ;;  %p861_p13 = pneg %p860_p12 }
  0x38   : > { %p866_p4 = pnand %p865_p3, %p861_p13 }
  0x3a   : > { %722 = vmatpush.xpose.msk.msra.mxu1 %vm390_vm1, %v297_v59 }
  0x3c   : > { %260 = vadd.xlane.f32.xlu1 %v259_v24 }
  0x3d   : > { %236 = vadd.xlane.f32.xlu0 %v235_v25 }
  0x3e   : > { %239 = vadd.xlane.f32.xlu2 %v238_v26  ;;  %723 = vmatpush.xpose.msk.msra.mxu1 %vm390_vm1, %v296_v61  ;;  %v322_v26 = vadd.s32 4294967280, %v316_v62 }
  0x42   : > { %724 = vmatpush.xpose.msk.msra.mxu1 %vm390_vm1, %v295_v16 }
  0x44   : > { %242 = vadd.xlane.f32.xlu1 %v241_v33 }
  0x45   : > { %263 = vadd.xlane.f32.xlu0 %v262_v34 }
  0x46   : > { %266 = vadd.xlane.f32.xlu2 %v265_v35  ;;  %v326_v35 = vadd.s32 4294967272, %v316_v62 }
  0x4c   : > { %269 = vadd.xlane.f32.xlu1 %v268_v42 }
  0x4d   : > { %245 = vadd.xlane.f32.xlu0 %v244_v43  ;;  %v294_v43 = vld [vmem:[%s1310_s2 + $0x18] sm:$0xff] }
  0x4e   : > { %248 = vadd.xlane.f32.xlu2 %v247_v44  ;;  %725 = vmatpush.xpose.msk.msra.mxu1 %vm390_vm1, %v294_v43 }
  0x55   : > { %272 = vadd.xlane.f32.xlu0 %v271_v47 }
  0x9f   : > { %v252_v48 = vpop.xlane.xlu1 %251 }
  0xa0   : > { %v228_v49 = vpop.xlane.xlu0 %227  ;;  %v282_v17 = vmul.f32 0.00390625, %v252_v48 }
  0xa1   : > { %v234_v50 = vpop.xlane.xlu2 %233  ;;  %v274_v24 = vmul.f32 0.00390625, %v228_v49 }
  0xa2   : > { %v276_v33 = vmul.f32 0.00390625, %v234_v50  ;;  %v346_v47 = vperm.slane %v282_v17, %v316_v62 }
  0xa4   : > { %v323_v49 = vperm.slane %v276_v33, %v322_v26 }
  0xa7   : > { %v255_v51 = vpop.xlane.xlu1 %254 }
  0xa8   : > { %v231_v52 = vpop.xlane.xlu0 %230  ;;  %v283_v25 = vmul.f32 0.00390625, %v255_v51  ;;  %v330_v51 = vadd.s32 4294967264, %v316_v62 }
  0xa9   : > { %v258_v53 = vpop.xlane.xlu2 %257  ;;  %v275_v15 = vmul.f32 0.00390625, %v231_v52  ;;  %v317_v52 = vperm.slane %v274_v24, %v316_v62 }
  0xaa   : > { %v284_v44 = vmul.f32 0.00390625, %v258_v53  ;;  %v347_v54 = vperm.slane %v283_v25, %v318_v8  ;;  %v293_v53 = vld [vmem:[%s1310_s2 + $0x10] sm:$0xff] }
  0xab   : > { %v319_v34 = vperm.slane %v275_v15, %v318_v8  ;;  %v334_v15 = vadd.s32 4294967256, %v316_v62  ;;  %726 = vmatpush.xpose.msk.msra.mxu1 %vm390_vm1, %v293_v53 }
  0xac   : > { %v349_v17 = vperm.slane %v284_v44, %v322_v26  ;;  %v342_v26 = vadd.s32 4294967240, %v316_v62 }
  0xaf   : > { %v261_v55 = vpop.xlane.xlu1 %260 }
  0xb0   : > { %v237_v57 = vpop.xlane.xlu0 %236  ;;  %v285_v48 = vmul.f32 0.00390625, %v261_v55  ;;  %v338_v55 = vadd.s32 4294967248, %v316_v62 }
  0xb1   : > { %v240_v58 = vpop.xlane.xlu2 %239  ;;  %v277_v42 = vmul.f32 0.00390625, %v237_v57  ;;  %v321_v57 = vsel %vm320_vm2, %v319_v34, %v317_v52 }
  0xb2   : > { %v278_v56 = vmul.f32 0.00390625, %v240_v58  ;;  %v348_v58 = vsel %vm320_vm2, %v347_v54, %v346_v47  ;;  %v325_v33 = vsel %vm324_vm3, %v323_v49, %v321_v57 }
  0xb3   : > { %v327_v61 = vperm.slane %v277_v42, %v326_v35 }
  0xb4   : > { %v331_v34 = vperm.slane %v278_v56, %v330_v51 }
  0xb5   : > { %v329_v43 = vsel %vm328_vm4, %v327_v61, %v325_v33 }
  0xb7   : > { %v243_v63 = vpop.xlane.xlu1 %242 }
  0xb8   : > { %v264_v3 = vpop.xlane.xlu0 %263  ;;  %v279_v16 = vmul.f32 0.00390625, %v243_v63 }
  0xb9   : > { %v267_v7 = vpop.xlane.xlu2 %266  ;;  %v286_v50 = vmul.f32 0.00390625, %v264_v3  ;;  %v351_v3 = vperm.slane %v285_v48, %v326_v35  ;;  %v350_v35 = vsel %vm324_vm3, %v349_v17, %v348_v58 }
  0xba   : > { %v287_v25 = vmul.f32 0.00390625, %v267_v7  ;;  %v335_v52 = vperm.slane %v279_v16, %v334_v15 }
  0xbb   : > { %v353_v42 = vperm.slane %v286_v50, %v330_v51  ;;  %v352_v47 = vsel %vm328_vm4, %v351_v3, %v350_v35  ;;  %v1318_v3 = vlaneseq }
  0xbc   : > { %v355_v54 = vperm.slane %v287_v25, %v334_v15 }
  0xbd   : > { %v354_v48 = vsel %vm332_vm5, %v353_v42, %v352_v47  ;;  %v459_v25 = vshrl.u32 %v1318_v3, 7 }
  0xbe   : > { %v356_v61 = vsel %vm336_vm6, %v355_v54, %v354_v48 }
  0xbf   : > { %v270_v60 = vpop.xlane.xlu1 %269  ;;  %791 = vset.pattern.permute.xlu1 %v459_v25  ;;  %v472_v33 = vadd.s32 16, %v459_v25 }
  0xc0   : > { %v246_v59 = vpop.xlane.xlu0 %245  ;;  %v288_v63 = vmul.f32 0.00390625, %v270_v60  ;;  %v333_v60 = vsel %vm332_vm5, %v331_v34, %v329_v43  ;;  %v466_v34 = vadd.s32 8, %v459_v25 }
  0xc1   : > { %v280_v8 = vmul.f32 0.00390625, %v246_v59  ;;  %v249_v24 = vpop.xlane.xlu2 %248  ;;  %v292_v59 = vld [vmem:[%s1310_s2 + $0x8] sm:$0xff]  ;;  %v337_v62 = vsel %vm336_vm6, %v335_v52, %v333_v60  ;;  %793 = vset.pattern.permute.xlu0 %v472_v33 }
  0xc2   : > { %v281_v44 = vmul.f32 0.00390625, %v249_v24  ;;  %v357_v49 = vperm.slane %v288_v63, %v338_v55  ;;  %727 = vmatpush.xpose.msk.msra.mxu1 %vm390_vm1, %v292_v59  ;;  %792 = vset.pattern.permute.xlu2 %v466_v34 }
  0xc3   : > { %v339_v7 = vperm.slane %v280_v8, %v338_v55  ;;  %v291_v55 = vld [vmem:[%s1310_s2] sm:$0xff] }
  0xc4   : > { %v343_v56 = vperm.slane %v281_v44, %v342_v26  ;;  %v358_v53 = vsel %vm340_vm7, %v357_v49, %v356_v61  ;;  %v490_v61 = vadd.s32 40, %v459_v25 }
  0xc5   : > { %v341_v57 = vsel %vm340_vm7, %v339_v7, %v337_v62  ;;  %v478_v62 = vadd.s32 24, %v459_v25 }
  0xc6   : > { %v345_v17 = vsel %vm344_vm8, %v343_v56, %v341_v57  ;;  %728 = vmatpush.xpose.msk.msra.mxu1 %vm390_vm1, %v291_v55  ;;  %v484_v56 = vadd.s32 32, %v459_v25  ;;  %v496_v57 = vadd.s32 48, %v459_v25 }
  0xc8   : > { %v273_v51 = vpop.xlane.xlu0 %272 }
  0xc9   : > { %v289_v50 = vmul.f32 0.00390625, %v273_v51 }
  0xcb   : > { %v359_v16 = vperm.slane %v289_v50, %v342_v26 }
  0xcd   : > { %v360_v15 = vsel %vm344_vm8, %v359_v16, %v358_v53  ;;  %v502_v16 = vadd.s32 56, %v459_v25 }
  0xce   : > { %v362_v8 = vsel %vm361_vm9, %v360_v15, %v345_v17 }
  0xcf   : > { %720 = vmatmul.msk.f32.vlgmr.msra.gmra.mxu0 %vm363_vm0, %v362_v8 }
 0x14c   : > { %v386_v24 = vpop.f32.mrf.mxu0 }
 0x14d   : > { %v389_v58 = vmax.f32 %v386_v24, 0.0 }
 0x14f   : > { %729 = vmatmul.msk.f32.vlgmr.msra.gmra.mxu1 %vm390_vm1, %v389_v58 }
 0x1cc   : > { %v435_v42 = vpop.f32.mrf.mxu1 }
 0x1cd   : > { %v730_v63 = vmul.f32 -1.442695, %v435_v42 }
 0x1cf   : > { %808 = vpow2.f32 %v730_v63 }
 0x1d5   : > { %v809_v43 = vpop.eup %808 }
 0x1d6   : > { %v441_v52 = vadd.f32 1.0, %v809_v43 }
 0x1d8   : > { %810 = vrcp.f32 %v441_v52  ;;  %v453_v35 = vand.u32 2147483648, %v441_v52  ;;  %v451_v47 = vand.u32 2147483647, %v441_v52  ;;  %vm447_vm11 = vweird.f32 %v441_v52 }
 0x1da   : > { %v454_v60 = vor.u32 1.1754944e-38, %v453_v35  ;;  %vm452_vm13 = vcmp.eq.f32.partialorder %v451_v47, 8.507059e+37 }
 0x1de   : > { %v811_v26 = vpop.eup %810 }
 0x1df   : > { %v443_v44 = vmul.f32 %v811_v26, %v441_v52  ;;  %vm448_vm10 = vweird.f32 %v811_v26 }
 0x1e0   : > { %vm449_vm12 = vmor %vm447_vm11, %vm448_vm10 }
 0x1e1   : > { %v444_v59 = vsub.f32 1.0, %v443_v44 }
 0x1e3   : > { %v445_v7 = vmul.f32 %v811_v26, %v444_v59 }
 0x1e5   : > { %v446_v54 = vadd.f32 %v811_v26, %v445_v7 }
 0x1e7   : > { %v450_v48 = vsel %vm449_vm12, %v811_v26, %v446_v54 }
 0x1e8   : > { %v455_v49 = vsel %vm452_vm13, %v454_v60, %v450_v48 }
 0x1e9   : > { %v457_v51 = vperm.slane %v455_v49, 0  ;;  %v506_v50 = vperm.slane %v455_v49, 1 }
 0x1eb   : > { %474 = vperm.xlu0 %793, %v457_v51   ;;  %468 = vperm.xlu2 %792, %v457_v51  }
 0x1ec   : > { %462 = vperm.xlu1 %791, %v457_v51  }
 0x1f3   : > { %800 = vset.pattern.permute.xlu0 %v466_v34  ;;  %794 = vset.pattern.permute.xlu2 %v478_v62 }
 0x1f4   : > { %795 = vset.pattern.permute.xlu1 %v484_v56 }
 0x1fb   : > { %517 = vperm.xlu0 %800, %v506_v50   ;;  %480 = vperm.xlu2 %794, %v457_v51  }
 0x1fc   : > { %486 = vperm.xlu1 %795, %v457_v51  }
 0x203   : > { %805 = vset.pattern.permute.xlu0 %v496_v57  ;;  %796 = vset.pattern.permute.xlu2 %v490_v61 }
 0x204   : > { %797 = vset.pattern.permute.xlu1 %v496_v57 }
 0x20b   : > { %547 = vperm.xlu0 %805, %v506_v50   ;;  %492 = vperm.xlu2 %796, %v457_v51  }
 0x20c   : > { %498 = vperm.xlu1 %797, %v457_v51  }
 0x213   : > { %798 = vset.pattern.permute.xlu2 %v502_v16  ;;  %807 = vset.pattern.permute.xlu0 %v502_v16 }
 0x214   : > { %799 = vset.pattern.permute.xlu1 %v459_v25 }
 0x21b   : > { %504 = vperm.xlu2 %798, %v457_v51  }
 0x21c   : > { %511 = vperm.xlu1 %799, %v506_v50  }
 0x223   : > { %801 = vset.pattern.permute.xlu2 %v472_v33 }
 0x224   : > { %802 = vset.pattern.permute.xlu1 %v478_v62 }
 0x22b   : > { %523 = vperm.xlu2 %801, %v506_v50  }
 0x22c   : > { %529 = vperm.xlu1 %802, %v506_v50  }
 0x233   : > { %803 = vset.pattern.permute.xlu2 %v484_v56 }
 0x234   : > { %804 = vset.pattern.permute.xlu1 %v490_v61 }
 0x23b   : > { %535 = vperm.xlu2 %803, %v506_v50  }
 0x23c   : > { %541 = vperm.xlu1 %804, %v506_v50  }
 0x243   : > { %806 = vset.pattern.permute.xlu2 %v502_v16 }
 0x245   : > { %v469_v53 = vpop.permute.xlu2 %468 }
 0x246   : > { %v557_v17 = vmul.f32 %v469_v53, %v1062_v11  ;;  %v558_v15 = vmul.f32 %v469_v53, %v1065_v12 }
 0x248   : > { %589 = vst [vmem:[%s1211_s7 + $0x10] sm:$0xff] %v557_v17 }
 0x249   : > { %590 = vst [vmem:[%s1211_s7 + $0x18] sm:$0xff] %v558_v15 }
 0x24b   : > { %553 = vperm.xlu2 %806, %v506_v50  }
 0x255   : > { %v481_v8 = vpop.permute.xlu2 %480 }
 0x256   : > { %v561_v55 = vmul.f32 %v481_v8, %v1086_v20  ;;  %v562_v11 = vmul.f32 %v481_v8, %v1089_v21 }
 0x258   : > { %593 = vst [vmem:[%s1211_s7 + $0x30] sm:$0xff] %v561_v55 }
 0x259   : > { %594 = vst [vmem:[%s1211_s7 + $0x38] sm:$0xff] %v562_v11 }
 0x25d   : > { %v475_v12 = vpop.permute.xlu0 %474 }
 0x25e   : > { %v559_v24 = vmul.f32 %v475_v12, %v1046_v5  ;;  %v560_v58 = vmul.f32 %v475_v12, %v1049_v6  ;;  %v463_v3 = vpop.permute.xlu1 %462 }
 0x25f   : > { %v555_v25 = vmul.f32 %v463_v3, %v1038_v2  ;;  %v556_v33 = vmul.f32 %v463_v3, %v1043_v4 }
 0x260   : > { %591 = vst [vmem:[%s1211_s7 + $0x20] sm:$0xff] %v559_v24 }
 0x261   : > { %592 = vst [vmem:[%s1211_s7 + $0x28] sm:$0xff] %v560_v58 }
 0x262   : > { %587 = vst [vmem:[%s1211_s7] sm:$0xff] %v555_v25 }
 0x263   : > { %588 = vst [vmem:[%s1211_s7 + $0x8] sm:$0xff] %v556_v33 }
 0x265   : > { %v493_v20 = vpop.permute.xlu2 %492 }
 0x266   : > { %v565_v21 = vmul.f32 %v493_v20, %v1104_v27  ;;  %v566_v5 = vmul.f32 %v493_v20, %v1107_v28 }
 0x268   : > { %597 = vst [vmem:[%s1211_s7 + $0x50] sm:$0xff] %v565_v21 }
 0x269   : > { %598 = vst [vmem:[%s1211_s7 + $0x58] sm:$0xff] %v566_v5 }
 0x26d   : > { %v518_v2 = vpop.permute.xlu0 %517 }
 0x26e   : > { %v573_v4 = vmul.f32 %v518_v2, %v1056_v9  ;;  %v574_v6 = vmul.f32 %v518_v2, %v1059_v10  ;;  %v487_v34 = vpop.permute.xlu1 %486 }
 0x26f   : > { %v563_v42 = vmul.f32 %v487_v34, %v1092_v22  ;;  %v564_v63 = vmul.f32 %v487_v34, %v1095_v23 }
 0x270   : > { %605 = vst [vmem:[%s1211_s7 + $0x90] sm:$0xff] %v573_v4 }
 0x271   : > { %606 = vst [vmem:[%s1211_s7 + $0x98] sm:$0xff] %v574_v6 }
 0x272   : > { %595 = vst [vmem:[%s1211_s7 + $0x40] sm:$0xff] %v563_v42 }
 0x273   : > { %596 = vst [vmem:[%s1211_s7 + $0x48] sm:$0xff] %v564_v63 }
 0x275   : > { %v505_v27 = vpop.permute.xlu2 %504 }
 0x276   : > { %v569_v28 = vmul.f32 %v505_v27, %v1140_v40  ;;  %v570_v9 = vmul.f32 %v505_v27, %v1143_v41 }
 0x278   : > { %601 = vst [vmem:[%s1211_s7 + $0x70] sm:$0xff] %v569_v28 }
 0x279   : > { %602 = vst [vmem:[%s1211_s7 + $0x78] sm:$0xff] %v570_v9 }
 0x27d   : > { %v548_v10 = vpop.permute.xlu0 %547 }
 0x27e   : > { %v583_v22 = vmul.f32 %v548_v10, %v1128_v36  ;;  %v584_v23 = vmul.f32 %v548_v10, %v1131_v37  ;;  %v499_v43 = vpop.permute.xlu1 %498 }
 0x27f   : > { %v567_v52 = vmul.f32 %v499_v43, %v1134_v38  ;;  %v568_v26 = vmul.f32 %v499_v43, %v1137_v39 }
 0x280   : > { %615 = vst [vmem:[%s1211_s7 + $0xe0] sm:$0xff] %v583_v22 }
 0x281   : > { %616 = vst [vmem:[%s1211_s7 + $0xe8] sm:$0xff] %v584_v23 }
 0x282   : > { %599 = vst [vmem:[%s1211_s7 + $0x60] sm:$0xff] %v567_v52 }
 0x283   : > { %600 = vst [vmem:[%s1211_s7 + $0x68] sm:$0xff] %v568_v26 }
 0x285   : > { %v524_v40 = vpop.permute.xlu2 %523 }
 0x286   : > { %v575_v41 = vmul.f32 %v524_v40, %v1068_v13  ;;  %v576_v36 = vmul.f32 %v524_v40, %v1071_v14 }
 0x288   : > { %607 = vst [vmem:[%s1211_s7 + $0xa0] sm:$0xff] %v575_v41 }
 0x289   : > { %608 = vst [vmem:[%s1211_s7 + $0xa8] sm:$0xff] %v576_v36 }
 0x28e   : > { %v512_v37 = vpop.permute.xlu1 %511 }
 0x28f   : > { %v571_v38 = vmul.f32 %v512_v37, %v1032_v0  ;;  %v572_v39 = vmul.f32 %v512_v37, %v1035_v1 }
 0x291   : > { %603 = vst [vmem:[%s1211_s7 + $0x80] sm:$0xff] %v571_v38 }
 0x292   : > { %604 = vst [vmem:[%s1211_s7 + $0x88] sm:$0xff] %v572_v39 }
 0x295   : > { %v536_v44 = vpop.permute.xlu2 %535 }
 0x296   : > { %v579_v59 = vmul.f32 %v536_v44, %v1110_v29  ;;  %v580_v13 = vmul.f32 %v536_v44, %v1113_v30 }
 0x298   : > { %611 = vst [vmem:[%s1211_s7 + $0xc0] sm:$0xff] %v579_v59 }
 0x299   : > { %612 = vst [vmem:[%s1211_s7 + $0xc8] sm:$0xff] %v580_v13 }
 0x29e   : > { %v530_v14 = vpop.permute.xlu1 %529 }
 0x29f   : > { %v577_v35 = vmul.f32 %v530_v14, %v1080_v18  ;;  %v578_v0 = vmul.f32 %v530_v14, %v1083_v19 }
 0x2a1   : > { %609 = vst [vmem:[%s1211_s7 + $0xb0] sm:$0xff] %v577_v35 }
 0x2a2   : > { %610 = vst [vmem:[%s1211_s7 + $0xb8] sm:$0xff] %v578_v0 }
 0x2a5   : > { %v554_v1 = vpop.permute.xlu2 %553 }
 0x2a6   : > { %v585_v7 = vmul.f32 %v554_v1, %v1152_v45  ;;  %v586_v29 = vmul.f32 %v554_v1, %v1155_v46 }
 0x2a8   : > { %617 = vst [vmem:[%s1211_s7 + $0xf0] sm:$0xff] %v585_v7 }
 0x2a9   : > { %618 = vst [vmem:[%s1211_s7 + $0xf8] sm:$0xff] %v586_v29 }
 0x2ae   : > { %v542_v18 = vpop.permute.xlu1 %541 }
 0x2af   : > { %v581_v19 = vmul.f32 %v542_v18, %v1116_v31  ;;  %v582_v30 = vmul.f32 %v542_v18, %v1119_v32 }
 0x2b1   : > { %613 = vst [vmem:[%s1211_s7 + $0xd0] sm:$0xff] %v581_v19 }
 0x2b2   : > { %614 = vst [vmem:[%s1211_s7 + $0xd8] sm:$0xff] %v582_v30 }
 0x2b3   : > { %869 = shalt.err (!%p866_p4)
}
 0x2b4   : > { %s912_s29 = smov 256   ;;  %s913_s6 = smov 16  }
 0x2b5   : > { %743 = dma.vmem_to_hbm [thread:$0]  (%p983_p10), %s634_s11, 4096, %s636_s17, %s620_s19, %s912_s29, %s912_s29, %s913_s6  }
 0x2b6 PF: > { %p754_p5 = scmp.ge.s32.totalorder %s908_s15, 2  ;;  %s650_s23 = sand.u32 1, %s896_s12  }
 0x2b7   : > { %s651_s5 = scalar_lea.sflag [#allocation4], %s650_s23 }
 0x2b8   : > { %p750_p7 = pnand %p754_p5, %p987_p11 }
 0x2ba   : > { %p751_p8 = pneg %p750_p7 }
 0x2bc   : > { %891 = dma.done.wait (%p751_p8), %s651_s5, 4096  }
 0x2bd   : > { %893 = vsyncadd (%p751_p8), %s651_s5, 4294963200  ;;  %p16_p9 = scmp.ge.s32.totalorder %s959_s18, 6   ;;  %s1319_s12 = smov %s900_s13 }
 0x2be   : > { %s1320_s13 = smov %s904_s14  ;;  %s1321_s14 = smov %s971_s21 }
 0x2bf   : > { %s1322_s15 = smov %s959_s18  ;;  %18 = sbr.rel (!%p16_p9) target bundleno = 5 (0x5), region = 77 }
 0x2c4   :  { %657 = vsyncpa [#allocation3], 1 }
 0x2c5   :  { %659 = vsyncpa [#allocation3 + $0x1], 1 }
 0x2c6   :  { %660 = vsyncpa [#allocation4], 1 }
 0x2c7   :  { %662 = vsyncpa [#allocation4 + $0x1], 1 }

</bundles_post_ra>
